<compile_context>
chip_gen: v7x
topology: tpu7x:2x2x1
jax: 0.10.0
libtpu: 0.0.40
codegen_flags: <defaults>
</compile_context>

<pallas_src>
import functools

import jax
import jax.numpy as jnp
from jax.experimental import pallas as pl
from jax.experimental.pallas import tpu as pltpu

NEG_SLOPE = 0.01        # nn.LeakyReLU() default negative_slope
LANE = 128              # TPU lane width
TB_MAX = 2048           # hard ceiling on batch-tile rows


def _round_up(x, m):
    return (x + m - 1) // m * m


def _leaky_relu_f32(x):
    # f32 elementwise on the VPU (works on v5e which has no bf16 VALU)
    return jnp.where(x > 0, x, NEG_SLOPE * x)


@functools.lru_cache(maxsize=None)
def _vmem_budget_bytes():
    """Generation-aware VMEM budget: physical capacity minus headroom,
    never above 100 MiB (v5e/v6e) and ~52 MiB on v7x (64 MiB per TC)."""
    try:
        cap = pltpu.get_tpu_info().vmem_capacity_bytes
    except Exception:
        cap = 64 << 20  # conservative fallback (v7x per-TC size)
    return int(max(16 << 20, min(cap - (12 << 20), 100 << 20)))


def _choose_tile(B, tb_cap):
    """Pick (tile_rows, padded_batch).  Prefer tiles that divide B exactly so
    we never re-materialize the whole activation just to pad a few rows."""
    if B <= tb_cap:
        tb = max(16, _round_up(B, 16))       # 16: bf16 packs 16 sublanes/vreg
        return tb, tb
    start = tb_cap - (tb_cap % 16)
    for tb in range(start, 255, -16):        # largest multiple-of-16 divisor
        if B % tb == 0:
            return tb, B
    return start, _round_up(B, start)


def mlp_kernel(x_ref, w1_ref, b1_ref, w2_ref, b2_ref, w3_ref, b3_ref, o_ref):
    # Cast the input tile to bf16 in-kernel (hides under the input DMA;
    # halves input HBM traffic vs a wrapper-side cast).
    x = x_ref[...].astype(jnp.bfloat16)
    # Layer 1: bf16 MXU matmul, f32 accumulate; bias + LeakyReLU in f32
    h = jnp.dot(x, w1_ref[...], preferred_element_type=jnp.float32)
    h = _leaky_relu_f32(h + b1_ref[...])
    # Layer 2
    h = jnp.dot(h.astype(jnp.bfloat16), w2_ref[...],
                preferred_element_type=jnp.float32)
    h = _leaky_relu_f32(h + b2_ref[...])
    # Layer 3 (logits, lane-padded to 128 -> unmasked full-width store)
    out = jnp.dot(h.astype(jnp.bfloat16), w3_ref[...],
                  preferred_element_type=jnp.float32) + b3_ref[...]
    o_ref[...] = out


def prepare_params(params):
    """One-time (model-load) weight prep: bf16 cast + lane-padding of the
    final layer.  Call once and reuse -- keeps per-call HBM traffic down."""
    w1, b1, w2, b2, w3, b3 = params
    hidden = w3.shape[0]
    num_classes = w3.shape[1]
    nout_pad = _round_up(num_classes, LANE)

    w3p = jnp.zeros((hidden, nout_pad), jnp.float32).at[:, :num_classes].set(w3)
    b3p = jnp.zeros((1, nout_pad), jnp.float32).at[:, :num_classes].set(b3)

    prepared = (w1.astype(jnp.bfloat16), b1.astype(jnp.float32),
                w2.astype(jnp.bfloat16), b2.astype(jnp.float32),
                w3p.astype(jnp.bfloat16), b3p.astype(jnp.float32))
    return prepared, num_classes


@functools.partial(jax.jit, static_argnames=("num_classes",))
def my_pytorch_model_forward(x, prepared, num_classes):
    """x: (B, C, H, W) float32. Returns (B, num_classes) float32."""
    w1b, b1, w2b, b2, w3b, b3 = prepared

    B = x.shape[0]
    x2d = x.reshape(B, -1)                      # x.view(x.shape[0], -1); stays f32
    F = x2d.shape[1]
    H = w1b.shape[1]
    nout_pad = w3b.shape[1]

    vmem_budget = _vmem_budget_bytes()

    # Resident weights/biases (budget 2x: Mosaic may double-buffer even with a
    # constant index_map).
    w_bytes = 2 * (2 * (F * H + H * H + H * nout_pad) + 4 * (2 * H + nout_pad))
    # Per-row VMEM: double-buffered f32 x/out tiles + in-kernel f32/bf16 temps.
    per_row = 2 * 4 * (F + nout_pad) + (2 * F + 4 * H + 2 * H + 4 * nout_pad)
    avail = vmem_budget - w_bytes - (6 << 20)
    tb_cap = max(16, min(TB_MAX, max(avail, 0) // per_row // 16 * 16))

    tb, b_pad = _choose_tile(B, tb_cap)
    if b_pad != B:
        x2d = jnp.pad(x2d, ((0, b_pad - B), (0, 0)))
    grid = (b_pad // tb,)

    flops = 2 * b_pad * (F * H + H * H + H * nout_pad)
    bytes_accessed = (b_pad * F * 4
                      + 2 * (F * H + H * H + H * nout_pad)
                      + 4 * (2 * H + nout_pad)
                      + b_pad * nout_pad * 4)

    out = pl.pallas_call(
        mlp_kernel,
        out_shape=jax.ShapeDtypeStruct((b_pad, nout_pad), jnp.float32),
        grid=grid,
        in_specs=[
            pl.BlockSpec((tb, F), lambda i: (i, 0)),          # x: batch-tiled, f32
            pl.BlockSpec((F, H), lambda i: (0, 0)),           # w1: resident bf16
            pl.BlockSpec((1, H), lambda i: (0, 0)),           # b1 (f32)
            pl.BlockSpec((H, H), lambda i: (0, 0)),           # w2: resident bf16
            pl.BlockSpec((1, H), lambda i: (0, 0)),           # b2 (f32)
            pl.BlockSpec((H, nout_pad), lambda i: (0, 0)),    # w3 (lane-padded)
            pl.BlockSpec((1, nout_pad), lambda i: (0, 0)),    # b3 (lane-padded)
        ],
        out_specs=pl.BlockSpec((tb, nout_pad), lambda i: (i, 0)),
        compiler_params=pltpu.CompilerParams(
            dimension_semantics=("parallel",),                # v7x: 2 TCs
            vmem_limit_bytes=vmem_budget),
        cost_estimate=pl.CostEstimate(
            flops=flops, transcendentals=0, bytes_accessed=bytes_accessed),
    )(x2d, w1b, b1, w2b, b2, w3b, b3)

    return out[:B, :num_classes]


def init_params(key, input_size, hidden_size, num_classes):
    """Deterministic parameter init (PyTorch-like uniform fan-in scaling)."""
    ks = jax.random.split(key, 6)

    def linear(kw, kb, fan_in, fan_out):
        bound = 1.0 / jnp.sqrt(fan_in)
        w = jax.random.uniform(kw, (fan_in, fan_out), jnp.float32, -bound, bound)
        b = jax.random.uniform(kb, (1, fan_out), jnp.float32, -bound, bound)
        return w, b

    w1, b1 = linear(ks[0], ks[1], input_size, hidden_size)
    w2, b2 = linear(ks[2], ks[3], hidden_size, hidden_size)
    w3, b3 = linear(ks[4], ks[5], hidden_size, num_classes)
    return (w1, b1, w2, b2, w3, b3)


def reference_forward(x, params):
    """Pure-JAX reference, mirroring the kernel's bf16 matmul inputs / f32 accum."""
    w1, b1, w2, b2, w3, b3 = params
    bf = jnp.bfloat16
    h = x.reshape(x.shape[0], -1).astype(bf)
    h = jnp.dot(h, w1.astype(bf), preferred_element_type=jnp.float32) + b1
    h = jax.nn.leaky_relu(h, NEG_SLOPE)
    h = jnp.dot(h.astype(bf), w2.astype(bf), preferred_element_type=jnp.float32) + b2
    h = jax.nn.leaky_relu(h, NEG_SLOPE)
    return jnp.dot(h.astype(bf), w3.astype(bf), preferred_element_type=jnp.float32) + b3


if __name__ == "__main__":
    # hparams implied by the forward: flattened image -> hidden -> hidden -> classes
    B, C, H, W = 8, 4, 8, 8
    hparams = {"input_size": C * H * W, "hidden_size": 128, "num_classes": 10}

    key = jax.random.PRNGKey(0)
    kx, kp = jax.random.split(key)
    x = jax.random.normal(kx, (B, C, H, W), jnp.float32)
    params = init_params(kp, hparams["input_size"], hparams["hidden_size"],
                         hparams["num_classes"])

    # Weight prep happens once, outside the per-call path.
    prepared, num_classes = prepare_params(params)

    out = my_pytorch_model_forward(x, prepared, num_classes=num_classes)
    out = jax.block_until_ready(out)

    ref = reference_forward(x, params)
    assert out.shape == (B, hparams["num_classes"]), out.shape
    # bf16 matmul inputs -> compare against the bf16-matched reference.
    assert jnp.allclose(out, ref, atol=1e-2, rtol=1e-2), "mismatch vs reference"

    print("KERNEL_OK")
</pallas_src>

<mosaic_0001>
module attributes {stable_mosaic.version = 11 : i64} {
  func.func @mlp_kernel(%arg0: i32, %arg1: memref<16x256xf32, #tpu.memory_space<vmem>>, %arg2: memref<256x128xbf16, #tpu.memory_space<vmem>>, %arg3: memref<1x128xf32, #tpu.memory_space<vmem>>, %arg4: memref<128x128xbf16, #tpu.memory_space<vmem>>, %arg5: memref<1x128xf32, #tpu.memory_space<vmem>>, %arg6: memref<128x128xbf16, #tpu.memory_space<vmem>>, %arg7: memref<1x128xf32, #tpu.memory_space<vmem>>, %arg8: memref<16x128xf32, #tpu.memory_space<vmem>>) attributes {dimension_semantics = [#tpu.dimension_semantics<parallel>], iteration_bounds = array<i64: 1>, scalar_prefetch = 0 : i64, scratch_operands = 0 : i64, tpu.core_type = #tpu.core_type<tc>, window_params = [{transform_indices = @transform_0, window_bounds = array<i64: 16, 256>}, {pipeline_mode = #tpu.pipeline_mode<synchronous>, transform_indices = @transform_1, window_bounds = array<i64: 256, 128>}, {pipeline_mode = #tpu.pipeline_mode<synchronous>, transform_indices = @transform_2, window_bounds = array<i64: 1, 128>}, {pipeline_mode = #tpu.pipeline_mode<synchronous>, transform_indices = @transform_3, window_bounds = array<i64: 128, 128>}, {pipeline_mode = #tpu.pipeline_mode<synchronous>, transform_indices = @transform_4, window_bounds = array<i64: 1, 128>}, {pipeline_mode = #tpu.pipeline_mode<synchronous>, transform_indices = @transform_5, window_bounds = array<i64: 128, 128>}, {pipeline_mode = #tpu.pipeline_mode<synchronous>, transform_indices = @transform_6, window_bounds = array<i64: 1, 128>}, {transform_indices = @transform_7, window_bounds = array<i64: 16, 128>}]} {
    %c0 = arith.constant 0 : index
    %c0_0 = arith.constant 0 : index
    %0 = vector.load %arg1[%c0, %c0_0] : memref<16x256xf32, #tpu.memory_space<vmem>>, vector<16x256xf32>
    %1 = arith.truncf %0 : vector<16x256xf32> to vector<16x256xbf16>
    %c0_1 = arith.constant 0 : index
    %c0_2 = arith.constant 0 : index
    %2 = vector.load %arg2[%c0_1, %c0_2] : memref<256x128xbf16, #tpu.memory_space<vmem>>, vector<256x128xbf16>
    %cst = arith.constant dense<0.000000e+00> : vector<16x128xf32>
    %3 = tpu.matmul %1, %2, %cst {dimension_numbers = #tpu.dot_dimension_numbers<[1], [0], [0], [1], [0, 0, 1, 1], [], []>} : vector<16x256xbf16>, vector<256x128xbf16>, vector<16x128xf32> -> vector<16x128xf32>
    %c0_3 = arith.constant 0 : index
    %c0_4 = arith.constant 0 : index
    %4 = vector.load %arg3[%c0_3, %c0_4] : memref<1x128xf32, #tpu.memory_space<vmem>>, vector<1x128xf32>
    %5 = vector.broadcast %4 : vector<1x128xf32> to vector<16x128xf32>
    %6 = arith.addf %3, %5 : vector<16x128xf32>
    %cst_5 = arith.constant 0.000000e+00 : f32
    %7 = vector.broadcast %cst_5 : f32 to vector<16x128xf32>
    %8 = arith.cmpf ogt, %6, %7 : vector<16x128xf32>
    %cst_6 = arith.constant 0.00999999977 : f32
    %9 = vector.broadcast %cst_6 : f32 to vector<16x128xf32>
    %10 = arith.mulf %9, %6 : vector<16x128xf32>
    %11 = arith.select %8, %6, %10 : vector<16x128xi1>, vector<16x128xf32>
    %12 = arith.truncf %11 : vector<16x128xf32> to vector<16x128xbf16>
    %c0_7 = arith.constant 0 : index
    %c0_8 = arith.constant 0 : index
    %13 = vector.load %arg4[%c0_7, %c0_8] : memref<128x128xbf16, #tpu.memory_space<vmem>>, vector<128x128xbf16>
    %cst_9 = arith.constant dense<0.000000e+00> : vector<16x128xf32>
    %14 = tpu.matmul %12, %13, %cst_9 {dimension_numbers = #tpu.dot_dimension_numbers<[1], [0], [0], [1], [0, 0, 1, 1], [], []>} : vector<16x128xbf16>, vector<128x128xbf16>, vector<16x128xf32> -> vector<16x128xf32>
    %c0_10 = arith.constant 0 : index
    %c0_11 = arith.constant 0 : index
    %15 = vector.load %arg5[%c0_10, %c0_11] : memref<1x128xf32, #tpu.memory_space<vmem>>, vector<1x128xf32>
    %16 = vector.broadcast %15 : vector<1x128xf32> to vector<16x128xf32>
    %17 = arith.addf %14, %16 : vector<16x128xf32>
    %cst_12 = arith.constant 0.000000e+00 : f32
    %18 = vector.broadcast %cst_12 : f32 to vector<16x128xf32>
    %19 = arith.cmpf ogt, %17, %18 : vector<16x128xf32>
    %cst_13 = arith.constant 0.00999999977 : f32
    %20 = vector.broadcast %cst_13 : f32 to vector<16x128xf32>
    %21 = arith.mulf %20, %17 : vector<16x128xf32>
    %22 = arith.select %19, %17, %21 : vector<16x128xi1>, vector<16x128xf32>
    %23 = arith.truncf %22 : vector<16x128xf32> to vector<16x128xbf16>
    %c0_14 = arith.constant 0 : index
    %c0_15 = arith.constant 0 : index
    %24 = vector.load %arg6[%c0_14, %c0_15] : memref<128x128xbf16, #tpu.memory_space<vmem>>, vector<128x128xbf16>
    %cst_16 = arith.constant dense<0.000000e+00> : vector<16x128xf32>
    %25 = tpu.matmul %23, %24, %cst_16 {dimension_numbers = #tpu.dot_dimension_numbers<[1], [0], [0], [1], [0, 0, 1, 1], [], []>} : vector<16x128xbf16>, vector<128x128xbf16>, vector<16x128xf32> -> vector<16x128xf32>
    %c0_17 = arith.constant 0 : index
    %c0_18 = arith.constant 0 : index
    %26 = vector.load %arg7[%c0_17, %c0_18] : memref<1x128xf32, #tpu.memory_space<vmem>>, vector<1x128xf32>
    %27 = vector.broadcast %26 : vector<1x128xf32> to vector<16x128xf32>
    %28 = arith.addf %25, %27 : vector<16x128xf32>
    %c0_19 = arith.constant 0 : index
    %c0_20 = arith.constant 0 : index
    %29 = vector.load %arg8[%c0_19, %c0_20] : memref<16x128xf32, #tpu.memory_space<vmem>>, vector<16x128xf32>
    tpu.vector_store %arg8[%c0_19, %c0_20], %28 {strides = array<i32>} : memref<16x128xf32, #tpu.memory_space<vmem>>, vector<16x128xf32>,
    return
  }
  func.func @transform_0(%arg0: i32) -> (i32, i32) {
    %c0_i32 = arith.constant 0 : i32
    %c0_i32_0 = arith.constant 0 : i32
    return %arg0, %c0_i32 : i32, i32
  }
  func.func @transform_1(%arg0: i32) -> (i32, i32) {
    %c0_i32 = arith.constant 0 : i32
    %c0_i32_0 = arith.constant 0 : i32
    %c0_i32_1 = arith.constant 0 : i32
    return %c0_i32, %c0_i32_0 : i32, i32
  }
  func.func @transform_2(%arg0: i32) -> (i32, i32) {
    %c0_i32 = arith.constant 0 : i32
    %c0_i32_0 = arith.constant 0 : i32
    %c0_i32_1 = arith.constant 0 : i32
    return %c0_i32, %c0_i32_0 : i32, i32
  }
  func.func @transform_3(%arg0: i32) -> (i32, i32) {
    %c0_i32 = arith.constant 0 : i32
    %c0_i32_0 = arith.constant 0 : i32
    %c0_i32_1 = arith.constant 0 : i32
    return %c0_i32, %c0_i32_0 : i32, i32
  }
  func.func @transform_4(%arg0: i32) -> (i32, i32) {
    %c0_i32 = arith.constant 0 : i32
    %c0_i32_0 = arith.constant 0 : i32
    %c0_i32_1 = arith.constant 0 : i32
    return %c0_i32, %c0_i32_0 : i32, i32
  }
  func.func @transform_5(%arg0: i32) -> (i32, i32) {
    %c0_i32 = arith.constant 0 : i32
    %c0_i32_0 = arith.constant 0 : i32
    %c0_i32_1 = arith.constant 0 : i32
    return %c0_i32, %c0_i32_0 : i32, i32
  }
  func.func @transform_6(%arg0: i32) -> (i32, i32) {
    %c0_i32 = arith.constant 0 : i32
    %c0_i32_0 = arith.constant 0 : i32
    %c0_i32_1 = arith.constant 0 : i32
    return %c0_i32, %c0_i32_0 : i32, i32
  }
  func.func @transform_7(%arg0: i32) -> (i32, i32) {
    %c0_i32 = arith.constant 0 : i32
    %c0_i32_0 = arith.constant 0 : i32
    return %arg0, %c0_i32 : i32, i32
  }
}

</mosaic_0001>

<bundles_post_ra>
// kernel: my_pytorch_model_forward.1
= control target key start
LH: loop header
LB: loop body
LE: loop exit
PB: predicated region body
PF: predicated region fallthrough
CT: control target
= control target key end

     0   :  { %v602_v1 = vmov 0.0   ;;  %vm603_vm0 = vmmov 0   ;;  %s785_s1 = inlined_call_operand.vmem [shape: bf16[256,128], index: 1, kind: input, shape index: {}]   ;;  %s786_s0 = inlined_call_operand.vmem [shape: f32[16,256], index: 0, kind: input, shape index: {}]   ;;  %s787_s3 = inlined_call_operand.vmem [shape: bf16[128,128], index: 3, kind: input, shape index: {}]   ;;  %s788_s5 = inlined_call_operand.vmem [shape: bf16[128,128], index: 5, kind: input, shape index: {}]   ;;  %s789_s2 = inlined_call_operand.vmem [shape: f32[1,128], index: 2, kind: input, shape index: {}]   ;;  %s790_s4 = inlined_call_operand.vmem [shape: f32[1,128], index: 4, kind: input, shape index: {}]   ;;  %s791_s6 = inlined_call_operand.vmem [shape: f32[1,128], index: 6, kind: input, shape index: {}]   ;;  %s792_s7 = inlined_call_operand.vmem [shape: f32[16,128], index: 7, kind: output, shape index: {}]  }
   0x1   :  { %v570_v0 = vld [vmem:[%s785_s1 + $0x40] sm:$0xff]   ;;  %528 = vmatprep.subr.bf16.mxu1 %v602_v1  ;;  %v572_v3 = vld [vmem:[%s785_s1 + $0x48] sm:$0xff]   ;;  %v574_v5 = vld [vmem:[%s785_s1 + $0x50] sm:$0xff]   ;;  %544 = vmatprep.mubr.msk.bf16.mxu1 %vm603_vm0, %v602_v1 }
   0x2   :  { %v571_v2 = vld [vmem:[%s785_s1] sm:$0xff]   ;;  %488 = vmatprep.subr.bf16.mxu0 %v570_v0  ;;  %v573_v4 = vld [vmem:[%s785_s1 + $0x8] sm:$0xff]   ;;  %v575_v6 = vld [vmem:[%s785_s1 + $0x10] sm:$0xff]  }
   0x3   :  { %489 = vmatpush3.bf16.msra.mxu0 %v571_v2  ;;  %v576_v7 = vld [vmem:[%s785_s1 + $0x58] sm:$0xff]   ;;  %v578_v9 = vld [vmem:[%s785_s1 + $0x60] sm:$0xff]   ;;  %v580_v11 = vld [vmem:[%s785_s1 + $0x68] sm:$0xff]  }
   0x4   :  { %490 = vmatprep.subr.bf16.mxu0 %v572_v3  ;;  %v577_v8 = vld [vmem:[%s785_s1 + $0x18] sm:$0xff]   ;;  %v579_v10 = vld [vmem:[%s785_s1 + $0x20] sm:$0xff]   ;;  %v28_v12 = vld [vmem:[%s786_s0 + $0x8] sm:$0xff] }
   0x5   :  { %v30_v13 = vld [vmem:[%s786_s0 + $0x18] sm:$0xff]  ;;  %v581_v14 = vld [vmem:[%s785_s1 + $0x28] sm:$0xff]   ;;  %v586_v16 = vld [vmem:[%s787_s3] sm:$0xff]  }
   0x6   :  { %v32_v15 = vpack.c.bf16 %v30_v13, %v28_v12  ;;  %v582_v17 = vld [vmem:[%s785_s1 + $0x70] sm:$0xff]   ;;  %529 = vmatpush3.bf16.msra.mxu1 %v586_v16  ;;  %v587_v18 = vld [vmem:[%s787_s3 + $0x8] sm:$0xff]   ;;  %v584_v20 = vld [vmem:[%s785_s1 + $0x78] sm:$0xff]  }
   0x7   :  { %491 = vmatpush3.bf16.msra.mxu0 %v573_v4  ;;  %530 = vmatprep.subr.bf16.mxu1 %v602_v1  ;;  %v583_v19 = vld [vmem:[%s785_s1 + $0x30] sm:$0xff]   ;;  %v585_v22 = vld [vmem:[%s785_s1 + $0x38] sm:$0xff]   ;;  %v27_v23 = vld [vmem:[%s786_s0] sm:$0xff] }
   0x8   :  { %492 = vmatprep.subr.bf16.mxu0 %v574_v5  ;;  %200 = vmatprep.mubr.bf16.mxu0 %v32_v15  ;;  %v588_v21 = vld [vmem:[%s787_s3 + $0x10] sm:$0xff]   ;;  %v589_v25 = vld [vmem:[%s787_s3 + $0x18] sm:$0xff]   ;;  %v590_v27 = vld [vmem:[%s787_s3 + $0x20] sm:$0xff]  }
   0x9   :  { %v29_v24 = vld [vmem:[%s786_s0 + $0x10] sm:$0xff]  ;;  %v591_v28 = vld [vmem:[%s787_s3 + $0x28] sm:$0xff]   ;;  %v593_v30 = vld [vmem:[%s787_s3 + $0x38] sm:$0xff]  }
   0xa   :  { %531 = vmatpush3.bf16.msra.mxu1 %v587_v18  ;;  %v31_v26 = vpack.c.bf16 %v29_v24, %v27_v23  ;;  %v592_v29 = vld [vmem:[%s787_s3 + $0x30] sm:$0xff]   ;;  %v594_v31 = vld [vmem:[%s788_s5] sm:$0xff]   ;;  %v595_v32 = vld [vmem:[%s788_s5 + $0x8] sm:$0xff]  }
   0xb   :  { %493 = vmatpush3.bf16.msra.mxu0 %v575_v6  ;;  %532 = vmatprep.subr.bf16.mxu1 %v602_v1  ;;  %v596_v33 = vld [vmem:[%s788_s5 + $0x10] sm:$0xff]   ;;  %v597_v34 = vld [vmem:[%s788_s5 + $0x18] sm:$0xff]   ;;  %v598_v35 = vld [vmem:[%s788_s5 + $0x20] sm:$0xff]  }
   0xc   :  { %494 = vmatprep.subr.bf16.mxu0 %v576_v7  ;;  %v599_v36 = vld [vmem:[%s788_s5 + $0x28] sm:$0xff]   ;;  %v453_v38 = vld [vmem:[%s789_s2] ss:$0 sm:$0xff]  ;;  %v600_v51 = vld [vmem:[%s788_s5 + $0x30] sm:$0xff]  }
   0xd   :  { %v601_v52 = vld [vmem:[%s788_s5 + $0x38] sm:$0xff]   ;;  %v470_v53 = vld [vmem:[%s790_s4] ss:$0 sm:$0xff] }
   0xe   :  { %533 = vmatpush3.bf16.msra.mxu1 %v588_v21 }
   0xf   :  { %495 = vmatpush3.bf16.msra.mxu0 %v577_v8  ;;  %534 = vmatprep.subr.bf16.mxu1 %v602_v1 }
  0x10   :  { %496 = vmatprep.subr.bf16.mxu0 %v578_v9 }
  0x12   :  { %535 = vmatpush3.bf16.msra.mxu1 %v589_v25 }
  0x13   :  { %497 = vmatpush3.bf16.msra.mxu0 %v579_v10  ;;  %536 = vmatprep.subr.bf16.mxu1 %v602_v1 }
  0x14   :  { %498 = vmatprep.subr.bf16.mxu0 %v580_v11 }
  0x16   :  { %537 = vmatpush3.bf16.msra.mxu1 %v590_v27 }
  0x17   :  { %499 = vmatpush3.bf16.msra.mxu0 %v581_v14  ;;  %538 = vmatprep.subr.bf16.mxu1 %v602_v1 }
  0x18   :  { %500 = vmatprep.subr.bf16.mxu0 %v582_v17 }
  0x1a   :  { %539 = vmatpush3.bf16.msra.mxu1 %v591_v28 }
  0x1b   :  { %501 = vmatpush3.bf16.msra.mxu0 %v583_v19  ;;  %540 = vmatprep.subr.bf16.mxu1 %v602_v1 }
  0x1c   :  { %502 = vmatprep.subr.bf16.mxu0 %v584_v20 }
  0x1e   :  { %541 = vmatpush3.bf16.msra.mxu1 %v592_v29 }
  0x1f   :  { %503 = vmatpush3.bf16.msra.mxu0 %v585_v22  ;;  %542 = vmatprep.subr.bf16.mxu1 %v602_v1 }
  0x20   :  { %548 = vmatprep.subr.bf16.mxu0 %v602_v1 }
  0x22   :  { %201 = vmatmul.mubr.bf16.vlgmr.msra.gmra.mrb[0].mxu0 %v31_v26  ;;  %543 = vmatpush3.bf16.msra.mxu1 %v593_v30 }
  0x23   :  { %564 = vmatprep.mubr.msk.bf16.mxu0 %vm603_vm0, %v602_v1  ;;  %549 = vmatpush3.bf16.msra.mxu0 %v594_v31 }
  0x24   :  { %550 = vmatprep.subr.bf16.mxu0 %v602_v1 }
  0x27   :  { %551 = vmatpush3.bf16.msra.mxu0 %v595_v32 }
  0x28   :  { %552 = vmatprep.subr.bf16.mxu0 %v602_v1 }
  0x2b   :  { %553 = vmatpush3.bf16.msra.mxu0 %v596_v33 }
  0x2c   :  { %554 = vmatprep.subr.bf16.mxu0 %v602_v1 }
  0x2f   :  { %555 = vmatpush3.bf16.msra.mxu0 %v597_v34 }
  0x30   :  { %556 = vmatprep.subr.bf16.mxu0 %v602_v1 }
  0x33   :  { %557 = vmatpush3.bf16.msra.mxu0 %v598_v35 }
  0x34   :  { %558 = vmatprep.subr.bf16.mxu0 %v602_v1 }
  0x37   :  { %559 = vmatpush3.bf16.msra.mxu0 %v599_v36 }
  0x38   :  { %560 = vmatprep.subr.bf16.mxu0 %v602_v1 }
  0x3b   :  { %561 = vmatpush3.bf16.msra.mxu0 %v600_v51 }
  0x3c   :  { %562 = vmatprep.subr.bf16.mxu0 %v602_v1  ;;  %v479_v1 = vld [vmem:[%s791_s6] ss:$0 sm:$0xff] }
  0x3f   :  { %563 = vmatpush3.bf16.msra.mxu0 %v601_v52 }
  0xf5   :  { %v504_v37 = vpop.f32.mrb[0].mxu0 }
  0xf6   :  { %v505_v39 = vpop.f32.mrb[1].mxu0 }
  0xf7   :  { %v506_v40 = vadd.f32 %v505_v39, %v504_v37  ;;  %v507_v41 = vpop.f32.mrb[2].mxu0 }
  0xf8   :  { %v508_v42 = vpop.f32.mrb[3].mxu0 }
  0xf9   :  { %v203_v43 = vadd.f32 %v506_v40, %v453_v38  ;;  %v509_v44 = vadd.f32 %v508_v42, %v507_v41 }
  0xfb   :  { %v211_v45 = vmul.f32 0.01, %v203_v43  ;;  %v206_v46 = vadd.f32 %v509_v44, %v453_v38  ;;  %vm209_vm1 = vcmp.gt.f32.partialorder %v203_v43, 0.0 }
  0xfd   :  { %vm210_vm2 = vcmp.gt.f32.partialorder %v206_v46, 0.0  ;;  %v212_v47 = vmul.f32 0.01, %v206_v46  ;;  %v213_v48 = vsel %vm209_vm1, %v203_v43, %v211_v45 }
  0xff   :  { %v214_v49 = vsel %vm210_vm2, %v206_v46, %v212_v47 }
 0x100   :  { %v215_v50 = vpack.c.bf16 %v214_v49, %v213_v48 }
 0x102   :  { %545 = vmatmul.mubr.bf16.vlgmr.msra.gmra.mrb[0].mxu1 %v215_v50 }
 0x1d5   :  { %v321_v54 = vpop.f32.mrb[0].mxu1 }
 0x1d6   :  { %v322_v55 = vadd.f32 %v470_v53, %v321_v54  ;;  %v546_v56 = vpop.f32.mrb[1].mxu1 }
 0x1d7   :  { %v324_v57 = vpop.f32.mrb[2].mxu1 }
 0x1d8   :  { %v330_v58 = vmul.f32 0.01, %v322_v55  ;;  %v325_v59 = vadd.f32 %v470_v53, %v324_v57  ;;  %v547_v60 = vpop.f32.mrb[3].mxu1  ;;  %vm328_vm3 = vcmp.gt.f32.partialorder %v322_v55, 0.0 }
 0x1da   :  { %vm329_vm4 = vcmp.gt.f32.partialorder %v325_v59, 0.0  ;;  %v331_v61 = vmul.f32 0.01, %v325_v59  ;;  %v332_v62 = vsel %vm328_vm3, %v322_v55, %v330_v58 }
 0x1dc   :  { %v333_v63 = vsel %vm329_vm4, %v325_v59, %v331_v61 }
 0x1dd   :  { %v334_v0 = vpack.c.bf16 %v333_v63, %v332_v62 }
 0x1df   :  { %565 = vmatmul.mubr.bf16.vlgmr.msra.gmra.mrb[4].mxu0 %v334_v0 }
 0x2b2   :  { %v440_v2 = vpop.f32.mrb[4].mxu0 }
 0x2b3   :  { %v441_v3 = vadd.f32 %v479_v1, %v440_v2  ;;  %v566_v4 = vpop.f32.mrb[5].mxu0 }
 0x2b4   :  { %v443_v5 = vpop.f32.mrb[6].mxu0 }
 0x2b5   :  { %447 = vst [vmem:[%s792_s7] sm:$0xff] %v441_v3  ;;  %v444_v6 = vadd.f32 %v479_v1, %v443_v5  ;;  %v567_v7 = vpop.f32.mrb[7].mxu0 }
 0x2b7   :  { %448 = vst [vmem:[%s792_s7 + $0x8] sm:$0xff] %v444_v6 }

</bundles_post_ra>
